<compile_context>
chip_gen: v7x
topology: tpu7x:2x2x1
jax: 0.10.0
libtpu: 0.0.40
codegen_flags: <defaults>
</compile_context>

<pallas_src>
import numpy as np
import jax
import jax.numpy as jnp
from jax import lax
from jax.experimental import pallas as pl
from jax.experimental.pallas import tpu as pltpu


def _graph_kernel(x_ref, s_ref, a_ref, w_ref, wb_ref, b_ref, h_ref, logits_ref):
    """Per-graph DMGI hot path: fused GCN(feature)+GCN(shuf), readout, disc."""
    x = x_ref[0]            # (N, F)
    s = s_ref[0]            # (N, F)
    a = a_ref[0]            # (N, N)   dense adjacency
    w = w_ref[0]            # (F, Hd)  GCN linear weight (torch weight.T)
    wb = wb_ref[...]        # (Hd, Hd) bilinear discriminator weight
    bb = b_ref[0]           # scalar bilinear bias (SMEM)

    n = x.shape[0]
    hd = w.shape[1]

    # Fused GCN: relu(adj @ (X @ W)) for both branches with a single XW matmul
    # and a single adjacency matmul (dropout=identity, isBias=False).
    xs = jnp.concatenate([x, s], axis=0)                                # (2N, F)
    xsw = jnp.dot(xs, w, preferred_element_type=jnp.float32)            # (2N, Hd)
    xw_sw = jnp.concatenate([xsw[:n], xsw[n:]], axis=1)                 # (N, 2Hd)
    h = jnp.maximum(jnp.dot(a, xw_sw, preferred_element_type=jnp.float32), 0.0)
    h_ref[0] = h                                                        # [h1 | h2]

    h1 = h[:, :hd]
    h2 = h[:, hd:]

    # Readout: c = sigmoid(mean over nodes of h1).
    c = jax.nn.sigmoid(jnp.mean(h1, axis=0, keepdims=True))             # (1, Hd)

    # Bilinear discriminator, matmul-only: sc[n] = h[n] @ Wb @ c^T + b.
    contract_last = (((1,), (1,)), ((), ()))                            # A @ B^T
    cw = lax.dot_general(c, wb, contract_last,
                         preferred_element_type=jnp.float32)            # (1, Hd)
    sc1 = lax.dot_general(cw, h1, contract_last,
                          preferred_element_type=jnp.float32)           # (1, N)
    sc2 = lax.dot_general(cw, h2, contract_last,
                          preferred_element_type=jnp.float32)           # (1, N)
    # logits = cat((sc_1, sc_2), dim=1) -> lane-dense (1, 2N).
    logits_ref[0] = jnp.concatenate([sc1, sc2], axis=1) + bb            # (1, 2N)


@jax.jit
def _dmgi_forward_jit(feature, shuf, adj, w_gcn, w_bil, b_bil, H_param):
    G, N, F = feature.shape
    Hd = w_gcn.shape[-1]

    grid_spec = pltpu.PrefetchScalarGridSpec(
        num_scalar_prefetch=0,
        grid=(G,),
        in_specs=[
            pl.BlockSpec((1, N, F), lambda i: (i, 0, 0)),        # feature[g]
            pl.BlockSpec((1, N, F), lambda i: (i, 0, 0)),        # shuf[g]
            pl.BlockSpec((1, N, N), lambda i: (i, 0, 0)),        # adj[g]
            pl.BlockSpec((1, F, Hd), lambda i: (i, 0, 0)),       # per-graph GCN W
            pl.BlockSpec((Hd, Hd), lambda i: (0, 0)),            # shared bilinear W
            pl.BlockSpec(memory_space=pltpu.MemorySpace.SMEM),   # bilinear bias
        ],
        out_specs=(
            pl.BlockSpec((1, N, 2 * Hd), lambda i: (i, 0, 0)),   # packed [h1 | h2]
            pl.BlockSpec((1, 1, 2 * N), lambda i: (i, 0, 0)),    # lane-dense logits
        ),
    )
    h_packed, logits_all = pl.pallas_call(
        _graph_kernel,
        out_shape=(
            jax.ShapeDtypeStruct((G, N, 2 * Hd), jnp.float32),
            jax.ShapeDtypeStruct((G, 1, 2 * N), jnp.float32),
        ),
        grid_spec=grid_spec,
        compiler_params=pltpu.CompilerParams(
            dimension_semantics=("parallel",)),
    )(feature, shuf, adj, w_gcn, w_bil, b_bil)

    # reg_loss on the tiny (G, N, Hd) hidden states: plain jnp — a second
    # pallas_call launch would cost more than this reduction at this size.
    h1_mean = jnp.mean(h_packed[:, :, :Hd], axis=0)      # mean over graphs, (N, Hd)
    h2_mean = jnp.mean(h_packed[:, :, Hd:], axis=0)
    Hp = H_param[0]
    reg = jnp.sum((Hp - h1_mean) ** 2) - jnp.sum((Hp - h2_mean) ** 2)
    return logits_all, reg


def dmgi_forward(feature, shuf, adj, w_gcn, w_bil, b_bil, H_param):
    logits_all, reg = _dmgi_forward_jit(
        feature, shuf, adj, w_gcn, w_bil, b_bil, H_param)
    G = feature.shape[0]
    # Match the PyTorch module: result['logits'] is a list of per-graph (1, 2N).
    return {"logits": [logits_all[i] for i in range(G)], "reg_loss": reg}


def reference_forward_np(feature, shuf, adj, w_gcn, w_bil, b_bil, H_param):
    """Pure numpy (float64) reference mirroring the PyTorch forward."""
    f = np.asarray(feature, np.float64)
    s = np.asarray(shuf, np.float64)
    a = np.asarray(adj, np.float64)
    w = np.asarray(w_gcn, np.float64)
    wb = np.asarray(w_bil, np.float64)
    bb = float(np.asarray(b_bil)[0])
    Hp = np.asarray(H_param, np.float64)[0]
    G = f.shape[0]
    h1s, h2s, logits = [], [], []
    for i in range(G):
        h1 = np.maximum(a[i] @ (f[i] @ w[i]), 0.0)
        h2 = np.maximum(a[i] @ (s[i] @ w[i]), 0.0)
        c = 1.0 / (1.0 + np.exp(-h1.mean(axis=0)))
        sc1 = (h1 @ wb) @ c + bb
        sc2 = (h2 @ wb) @ c + bb
        logits.append(np.concatenate([sc1[None], sc2[None]], axis=1))
        h1s.append(h1)
        h2s.append(h2)
    h1m = np.mean(np.stack(h1s), axis=0)
    h2m = np.mean(np.stack(h2s), axis=0)
    reg = ((Hp - h1m) ** 2).sum() - ((Hp - h2m) ** 2).sum()
    return logits, reg


if __name__ == "__main__":
    G, N, F, Hd = 2, 64, 32, 32    # nb_graphs, nb_nodes, ft_size, hid_units

    key = jax.random.PRNGKey(0)
    ks = jax.random.split(key, 6)

    feature = jax.random.normal(ks[0], (G, N, F), jnp.float32)
    perm = jax.random.permutation(ks[1], N)
    shuf = feature[:, perm, :]                       # corrupted (row-shuffled) features
    adj_raw = jax.random.uniform(ks[2], (G, N, N), jnp.float32)
    adj = adj_raw / jnp.sum(adj_raw, axis=-1, keepdims=True)   # dense normalized adj

    # Deterministic parameter init (xavier-like scaling).
    w_gcn = jax.random.normal(ks[3], (G, F, Hd), jnp.float32) * (2.0 / (F + Hd)) ** 0.5
    w_bil = jax.random.normal(ks[4], (Hd, Hd), jnp.float32) * (2.0 / (Hd + Hd)) ** 0.5
    b_bil = jnp.full((1,), 0.01, jnp.float32)
    H_param = jax.random.normal(ks[5], (1, N, Hd), jnp.float32) * (2.0 / (N + Hd)) ** 0.5

    result = dmgi_forward(feature, shuf, adj, w_gcn, w_bil, b_bil, H_param)
    result = jax.block_until_ready(result)

    ref_logits, ref_reg = reference_forward_np(
        feature, shuf, adj, w_gcn, w_bil, b_bil, H_param)
    for got, want in zip(result["logits"], ref_logits):
        assert np.allclose(np.asarray(got), want, rtol=2e-3, atol=2e-3), "logits mismatch"
    assert np.allclose(float(result["reg_loss"]), ref_reg, rtol=2e-3, atol=1e-2), \
        "reg_loss mismatch"

    print("KERNEL_OK")
</pallas_src>

<mosaic_0001>
module attributes {stable_mosaic.version = 11 : i64} {
  func.func @_graph_kernel(%arg0: i32, %arg1: memref<1x64x32xf32, #tpu.memory_space<vmem>>, %arg2: memref<1x64x32xf32, #tpu.memory_space<vmem>>, %arg3: memref<1x64x64xf32, #tpu.memory_space<vmem>>, %arg4: memref<1x32x32xf32, #tpu.memory_space<vmem>>, %arg5: memref<32x32xf32, #tpu.memory_space<vmem>>, %arg6: memref<1xf32, #tpu.memory_space<smem>>, %arg7: memref<1x64x64xf32, #tpu.memory_space<vmem>>, %arg8: memref<1x1x128xf32, #tpu.memory_space<vmem>>) attributes {dimension_semantics = [#tpu.dimension_semantics<parallel>], iteration_bounds = array<i64: 2>, scalar_prefetch = 0 : i64, scratch_operands = 0 : i64, tpu.core_type = #tpu.core_type<tc>, window_params = [{transform_indices = @transform_0, window_bounds = array<i64: 1, 64, 32>}, {transform_indices = @transform_1, window_bounds = array<i64: 1, 64, 32>}, {transform_indices = @transform_2, window_bounds = array<i64: 1, 64, 64>}, {transform_indices = @transform_3, window_bounds = array<i64: 1, 32, 32>}, {pipeline_mode = #tpu.pipeline_mode<synchronous>, transform_indices = @transform_4, window_bounds = array<i64: 32, 32>}, {transform_indices = @transform_5, window_bounds = array<i64: 1>}, {transform_indices = @transform_6, window_bounds = array<i64: 1, 64, 64>}, {transform_indices = @transform_7, window_bounds = array<i64: 1, 1, 128>}]} {
    %c0 = arith.constant 0 : index
    %c0_0 = arith.constant 0 : index
    %c0_1 = arith.constant 0 : index
    %0 = vector.load %arg1[%c0, %c0_0, %c0_1] : memref<1x64x32xf32, #tpu.memory_space<vmem>>, vector<1x64x32xf32>
    %1 = vector.shape_cast %0 : vector<1x64x32xf32> to vector<64x32xf32>
    %c0_2 = arith.constant 0 : index
    %c0_3 = arith.constant 0 : index
    %c0_4 = arith.constant 0 : index
    %2 = vector.load %arg2[%c0_2, %c0_3, %c0_4] : memref<1x64x32xf32, #tpu.memory_space<vmem>>, vector<1x64x32xf32>
    %3 = vector.shape_cast %2 : vector<1x64x32xf32> to vector<64x32xf32>
    %c0_5 = arith.constant 0 : index
    %c0_6 = arith.constant 0 : index
    %c0_7 = arith.constant 0 : index
    %4 = vector.load %arg3[%c0_5, %c0_6, %c0_7] : memref<1x64x64xf32, #tpu.memory_space<vmem>>, vector<1x64x64xf32>
    %5 = vector.shape_cast %4 : vector<1x64x64xf32> to vector<64x64xf32>
    %c0_8 = arith.constant 0 : index
    %c0_9 = arith.constant 0 : index
    %c0_10 = arith.constant 0 : index
    %6 = vector.load %arg4[%c0_8, %c0_9, %c0_10] : memref<1x32x32xf32, #tpu.memory_space<vmem>>, vector<1x32x32xf32>
    %7 = vector.shape_cast %6 : vector<1x32x32xf32> to vector<32x32xf32>
    %c0_11 = arith.constant 0 : index
    %c0_12 = arith.constant 0 : index
    %8 = vector.load %arg5[%c0_11, %c0_12] : memref<32x32xf32, #tpu.memory_space<vmem>>, vector<32x32xf32>
    %c0_13 = arith.constant 0 : index
    %9 = memref.load %arg6[%c0_13] : memref<1xf32, #tpu.memory_space<smem>>
    %10 = tpu.concatenate %1, %3 in 0 : vector<64x32xf32>, vector<64x32xf32> -> vector<128x32xf32>
    %cst = arith.constant dense<0.000000e+00> : vector<128x32xf32>
    %11 = tpu.matmul %10, %7, %cst {dimension_numbers = #tpu.dot_dimension_numbers<[1], [0], [0], [1], [0, 0, 1, 1], [], []>} : vector<128x32xf32>, vector<32x32xf32>, vector<128x32xf32> -> vector<128x32xf32>
    %12 = vector.extract_strided_slice %11 {offsets = [0, 0], sizes = [64, 32], strides = [1, 1]} : vector<128x32xf32> to vector<64x32xf32>
    %13 = vector.extract_strided_slice %11 {offsets = [64, 0], sizes = [64, 32], strides = [1, 1]} : vector<128x32xf32> to vector<64x32xf32>
    %14 = tpu.concatenate %12, %13 in 1 : vector<64x32xf32>, vector<64x32xf32> -> vector<64x64xf32>
    %cst_14 = arith.constant dense<0.000000e+00> : vector<64x64xf32>
    %15 = tpu.matmul %5, %14, %cst_14 {dimension_numbers = #tpu.dot_dimension_numbers<[1], [0], [0], [1], [0, 0, 1, 1], [], []>} : vector<64x64xf32>, vector<64x64xf32>, vector<64x64xf32> -> vector<64x64xf32>
    %cst_15 = arith.constant 0.000000e+00 : f32
    %16 = vector.broadcast %cst_15 : f32 to vector<64x64xf32>
    %17 = arith.maximumf %15, %16 : vector<64x64xf32>
    %c0_16 = arith.constant 0 : index
    %c0_17 = arith.constant 0 : index
    %c0_18 = arith.constant 0 : index
    %18 = vector.load %arg7[%c0_16, %c0_17, %c0_18] : memref<1x64x64xf32, #tpu.memory_space<vmem>>, vector<1x64x64xf32>
    %19 = vector.shape_cast %18 : vector<1x64x64xf32> to vector<64x64xf32>
    %20 = vector.shape_cast %17 : vector<64x64xf32> to vector<1x64x64xf32>
    tpu.vector_store %arg7[%c0_16, %c0_17, %c0_18], %20 {strides = array<i32>} : memref<1x64x64xf32, #tpu.memory_space<vmem>>, vector<1x64x64xf32>,
    %21 = vector.extract_strided_slice %17 {offsets = [0, 0], sizes = [64, 32], strides = [1, 1]} : vector<64x64xf32> to vector<64x32xf32>
    %22 = vector.extract_strided_slice %17 {offsets = [0, 32], sizes = [64, 32], strides = [1, 1]} : vector<64x64xf32> to vector<64x32xf32>
    %cst_19 = arith.constant dense<0.000000e+00> : vector<32xf32>
    %23 = vector.multi_reduction <add>, %21, %cst_19 [0] : vector<64x32xf32> to vector<32xf32>
    %24 = vector.shape_cast %23 : vector<32xf32> to vector<1x32xf32>
    %cst_20 = arith.constant 6.400000e+01 : f32
    %25 = vector.broadcast %cst_20 : f32 to vector<1x32xf32>
    %26 = arith.divf %24, %25 : vector<1x32xf32>
    %27 = arith.negf %26 : vector<1x32xf32>
    %28 = math.exp %27 : vector<1x32xf32>
    %cst_21 = arith.constant 1.000000e+00 : f32
    %29 = vector.broadcast %cst_21 : f32 to vector<1x32xf32>
    %30 = arith.addf %29, %28 : vector<1x32xf32>
    %31 = arith.divf %29, %30 : vector<1x32xf32>
    %cst_22 = arith.constant dense<0.000000e+00> : vector<1x32xf32>
    %32 = tpu.matmul %31, %8, %cst_22 {dimension_numbers = #tpu.dot_dimension_numbers<[1], [1], [0], [0], [0, 0, 1, 0], [], []>} : vector<1x32xf32>, vector<32x32xf32>, vector<1x32xf32> -> vector<1x32xf32>
    %cst_23 = arith.constant dense<0.000000e+00> : vector<1x64xf32>
    %33 = tpu.matmul %32, %21, %cst_23 {dimension_numbers = #tpu.dot_dimension_numbers<[1], [1], [0], [0], [0, 0, 1, 0], [], []>} : vector<1x32xf32>, vector<64x32xf32>, vector<1x64xf32> -> vector<1x64xf32>
    %cst_24 = arith.constant dense<0.000000e+00> : vector<1x64xf32>
    %34 = tpu.matmul %32, %22, %cst_24 {dimension_numbers = #tpu.dot_dimension_numbers<[1], [1], [0], [0], [0, 0, 1, 0], [], []>} : vector<1x32xf32>, vector<64x32xf32>, vector<1x64xf32> -> vector<1x64xf32>
    %35 = tpu.concatenate %33, %34 in 1 : vector<1x64xf32>, vector<1x64xf32> -> vector<1x128xf32>
    %36 = vector.broadcast %9 : f32 to vector<1x128xf32>
    %37 = arith.addf %35, %36 : vector<1x128xf32>
    %c0_25 = arith.constant 0 : index
    %c0_26 = arith.constant 0 : index
    %c0_27 = arith.constant 0 : index
    %38 = vector.load %arg8[%c0_25, %c0_26, %c0_27] : memref<1x1x128xf32, #tpu.memory_space<vmem>>, vector<1x1x128xf32>
    %39 = vector.shape_cast %38 : vector<1x1x128xf32> to vector<1x128xf32>
    %40 = vector.shape_cast %37 : vector<1x128xf32> to vector<1x1x128xf32>
    tpu.vector_store %arg8[%c0_25, %c0_26, %c0_27], %40 {strides = array<i32>} : memref<1x1x128xf32, #tpu.memory_space<vmem>>, vector<1x1x128xf32>,
    return
  }
  func.func @transform_0(%arg0: i32) -> (i32, i32, i32) {
    %c0_i32 = arith.constant 0 : i32
    %c0_i32_0 = arith.constant 0 : i32
    %c0_i32_1 = arith.constant 0 : i32
    return %arg0, %c0_i32, %c0_i32_0 : i32, i32, i32
  }
  func.func @transform_1(%arg0: i32) -> (i32, i32, i32) {
    %c0_i32 = arith.constant 0 : i32
    %c0_i32_0 = arith.constant 0 : i32
    %c0_i32_1 = arith.constant 0 : i32
    return %arg0, %c0_i32, %c0_i32_0 : i32, i32, i32
  }
  func.func @transform_2(%arg0: i32) -> (i32, i32, i32) {
    %c0_i32 = arith.constant 0 : i32
    %c0_i32_0 = arith.constant 0 : i32
    %c0_i32_1 = arith.constant 0 : i32
    return %arg0, %c0_i32, %c0_i32_0 : i32, i32, i32
  }
  func.func @transform_3(%arg0: i32) -> (i32, i32, i32) {
    %c0_i32 = arith.constant 0 : i32
    %c0_i32_0 = arith.constant 0 : i32
    %c0_i32_1 = arith.constant 0 : i32
    return %arg0, %c0_i32, %c0_i32_0 : i32, i32, i32
  }
  func.func @transform_4(%arg0: i32) -> (i32, i32) {
    %c0_i32 = arith.constant 0 : i32
    %c0_i32_0 = arith.constant 0 : i32
    %c0_i32_1 = arith.constant 0 : i32
    return %c0_i32, %c0_i32_0 : i32, i32
  }
  func.func @transform_5(%arg0: i32) -> i32 {
    %c0_i32 = arith.constant 0 : i32
    %c0_i32_0 = arith.constant 0 : i32
    return %c0_i32 : i32
  }
  func.func @transform_6(%arg0: i32) -> (i32, i32, i32) {
    %c0_i32 = arith.constant 0 : i32
    %c0_i32_0 = arith.constant 0 : i32
    %c0_i32_1 = arith.constant 0 : i32
    return %arg0, %c0_i32, %c0_i32_0 : i32, i32, i32
  }
  func.func @transform_7(%arg0: i32) -> (i32, i32, i32) {
    %c0_i32 = arith.constant 0 : i32
    %c0_i32_0 = arith.constant 0 : i32
    %c0_i32_1 = arith.constant 0 : i32
    return %arg0, %c0_i32, %c0_i32_0 : i32, i32, i32
  }
}

</mosaic_0001>

<bundles_post_ra>
// kernel: _dmgi_forward_jit.1
= control target key start
LH: loop header
LB: loop body
LE: loop exit
PB: predicated region body
PF: predicated region fallthrough
CT: control target
= control target key end

     0   :  { %s1974_s0 = inlined_call_operand.vmem [shape: f32[2,64,32], index: 0, kind: input, shape index: {}]   ;;  %s1975_s1 = inlined_call_operand.vmem [shape: f32[2,64,32], index: 1, kind: input, shape index: {}]   ;;  %s1976_s2 = inlined_call_operand.vmem [shape: f32[2,64,64], index: 2, kind: input, shape index: {}]   ;;  %s1977_s3 = inlined_call_operand.vmem [shape: f32[2,32,32], index: 3, kind: input, shape index: {}]   ;;  %s1978_s4 = inlined_call_operand.vmem [shape: f32[32,32], index: 4, kind: input, shape index: {}]   ;;  %s1979_s5 = inlined_call_operand.<no memory space> [shape: f32[1], index: 5, kind: input, shape index: {}]   ;;  %s1980_s6 = inlined_call_operand.vmem [shape: f32[2,64,64], index: 6, kind: output, shape index: {0}]   ;;  %s1981_s7 = inlined_call_operand.hbm [shape: f32[2,1,128], index: 7, kind: output, shape index: {1}]  }
   0x1   :  { %13 = sst [smem:[#allocation2]] %s1979_s5 }
   0x2   :  { %14 = vsyncpa [#allocation4], 0 }
   0x3   :  { %16 = vsyncpa [#allocation4 + $0x1], 0  ;;  %s1726_s26 = smov 0   ;;  %s1728_s27 = smov 0  }
   0x4   :  { %s1730_s28 = smov 0   ;;  %s1732_s29 = smov 0  }
   0x5 LB: > { %s1747_s5 = sadd.s32 4294967295, %s1674_s29   ;;  %s1221_s30 = sadd.s32 4294967294, %s1674_s29   ;;  %s1674_s29 = sphi %s1732_s29, %s1989_s29   ;;  %s1670_s28 = sphi %s1730_s28, %s1988_s28   ;;  %s1666_s27 = sphi %s1728_s27, %s1987_s27   ;;  %s1662_s26 = sphi %s1726_s26, %s1986_s26  }
   0x6   : > { %s1751_s8 = sadd.s32 1, %s1674_s29   ;;  %s201_s9 = sadd.s32 1, %s1670_s28 }
   0x7   : > { %s198_s10 = ssub.s32 %s1674_s29, %s1751_s8  ;;  %p211_p0 = scmp.ne.s32.totalorder %s1670_s28, %s1666_s27 }
   0x8   : > { %p199_p1 = scmp.eq.s32.totalorder %s198_s10, 0  ;;  %p212_p2 = scmp.eq.s32.totalorder %s1747_s5, 1 }
   0x9   : > { %p217_p3 = scmp.ne.s32.totalorder %s1666_s27, %s1662_s26  ;;  %p218_p4 = scmp.eq.s32.totalorder %s1221_s30, 1 }
   0xa   : > { %s1762_s11 = scalar_select %p199_p1, %s1670_s28, %s201_s9  }
   0xb   : > { %p1764_p5 = por %p212_p2, %p211_p0  ;;  %p1768_p6 = por %p218_p4, %p217_p3 }
   0xc   : > { %p1224_p7 = scmp.ge.s32.totalorder %s1674_s29, 1  ;;  %p274_p8 = scmp.lt.s32.totalorder %s1674_s29, 3 }
   0xe   : > { %p275_p9 = pnand %p1224_p7, %p274_p8 }
   0xf   : > { %p325_p10 = scmp.lt.s32.totalorder (!%p275_p9), %s1747_s5, 1  ;;  %vm383_vm0 = vcmask (!%p275_p9), 261120   ;;  %s1676_s30 = smov (!%p275_p9), 32   ;;  %vm617_vm1 = vcmask (!%p275_p9), 523264   ;;  %vm1678_vm3 = vmmov (!%p275_p9), 0  }
  0x10   : > { %278 = sbr.rel (%p275_p9) target bundleno = 1234 (0x4d2), region = 44  ;;  %vm1845_vm2 = vmpackc.low (!%p275_p9), %vm383_vm0, %vm383_vm0  ;;  %s1681_s9 = smov (!%p275_p9), 64  }
  0x11   : > { %s382_s10 = sld [smem:[#allocation2]] (!%p275_p9) }
  0x17   : > { %s326_s14 = scalar_select %p325_p10, %s1747_s5, 1 }
  0x19   : > { %s1776_s15 = sshll.u32 %s326_s14, 6  ;;  %s1289_s16 = sshll.u32 %s326_s14, 5 }
  0x1a   : > { %s329_s19 = scalar_lea.vmem %s1974_s0, %s1776_s15  ;;  %s344_s22 = scalar_lea.vmem %s1977_s3, %s1289_s16 }
  0x1b   : > { %v350_v0 = vld [vmem:[%s329_s19] sm:$0xff]  ;;  %v375_v2 = vld [vmem:[%s344_s22 + $0x8] sm:$0xff]  ;;  %v376_v3 = vld [vmem:[%s344_s22 + $0x10] sm:$0xff]  ;;  %s334_s25 = scalar_lea.vmem %s1975_s1, %s1776_s15  ;;  %s1809_s14 = scalar_lea.vmem %s1976_s2, %s1776_s15 }
  0x1c   : > { %v374_v1 = vld [vmem:[%s344_s22] sm:$0xff]  ;;  %1358 = vmatprep.mubr.msk.f32.mxu0 %vm383_vm0, %v350_v0  ;;  %v377_v5 = vld [vmem:[%s344_s22 + $0x18] sm:$0xff]  ;;  %v351_v7 = vld [vmem:[%s329_s19 + $0x8] sm:$0xff]  ;;  %s1283_s16 = sshll.u32 %s1747_s5, 4  ;;  %s1682_s5 = smov [#allocation3]  }
  0x1d   : > { %v1459_v4 = vpack.c.bf16 %v375_v2, %v374_v1  ;;  %v1463_v6 = vpack.c.bf16 %v377_v5, %v376_v3  ;;  %v352_v8 = vld [vmem:[%s329_s19 + $0x10] sm:$0xff]  ;;  %v353_v9 = vld [vmem:[%s329_s19 + $0x18] sm:$0xff]  ;;  %v354_v10 = vld [vmem:[%s329_s19 + $0x20] sm:$0xff]  ;;  %s1932_s21 = scalar_lea.hbm %s1981_s7, %s1283_s16  ;;  %s1616_s24 = sshll.u32 %s1682_s5, 4  ;;  %s1617_s24 = int_to_ptr.vmem [resolvable:$false] %s1616_s24 }
  0x1e   : > { %v355_v11 = vld [vmem:[%s329_s19 + $0x28] sm:$0xff]  ;;  %v356_v12 = vld [vmem:[%s329_s19 + $0x30] sm:$0xff]  ;;  %v357_v13 = vld [vmem:[%s329_s19 + $0x38] sm:$0xff] }
  0x1f   : > { %1460 = vmatprep.subr.bf16.mxu0 %v1459_v4  ;;  %v358_v14 = vld [vmem:[%s334_s25] sm:$0xff]  ;;  %v359_v15 = vld [vmem:[%s334_s25 + $0x8] sm:$0xff]  ;;  %v360_v16 = vld [vmem:[%s334_s25 + $0x10] sm:$0xff] }
  0x20   : > { %1462 = vmatpush3.bf16.msra.mxu0 %v1459_v4  ;;  %v361_v17 = vld [vmem:[%s334_s25 + $0x18] sm:$0xff]  ;;  %v362_v18 = vld [vmem:[%s334_s25 + $0x20] sm:$0xff]  ;;  %v363_v19 = vld [vmem:[%s334_s25 + $0x28] sm:$0xff] }
  0x21   : > { %1464 = vmatprep.subr.bf16.mxu0 %v1463_v6  ;;  %v364_v20 = vld [vmem:[%s334_s25 + $0x30] sm:$0xff]  ;;  %v365_v21 = vld [vmem:[%s334_s25 + $0x38] sm:$0xff]  ;;  %v366_v38 = vld [vmem:[%s1809_s14] sm:$0xff]  ;;  %s1618_s25 = scalar_lea.vmem %s1617_s24, 32 }
  0x22   : > { %1398 = vmatprep.mubr.msk.f32.mxu1 %vm617_vm1, %v366_v38  ;;  %v367_v3 = vld [vmem:[%s1809_s14 + $0x8] sm:$0xff]  ;;  %v368_v4 = vld [vmem:[%s1809_s14 + $0x10] sm:$0xff]  ;;  %v369_v5 = vld [vmem:[%s1809_s14 + $0x18] sm:$0xff] }
  0x24   : > { %1466 = vmatpush3.bf16.msra.mxu0 %v1463_v6  ;;  %v370_v6 = vld [vmem:[%s1809_s14 + $0x20] sm:$0xff] }
  0x27   : > { %1359 = vmatmul.mubr.msk.f32.vlgmr.msra.gmra.mrb[0].mxu0 %vm383_vm0, %v351_v7  ;;  %v371_v7 = vld [vmem:[%s1809_s14 + $0x28] sm:$0xff] }
  0x28   : > { %1361 = vmatprep.mubr.msk.f32.mxu0 %vm383_vm0, %v352_v8  ;;  %v372_v8 = vld [vmem:[%s1809_s14 + $0x30] sm:$0xff] }
  0x2b   : > { %1362 = vmatmul.mubr.msk.f32.gmra.mrb[2].mxu0 %vm383_vm0, %v353_v9  ;;  %v373_v9 = vld [vmem:[%s1809_s14 + $0x38] sm:$0xff]  ;;  %s323_s14 = sand.u32 1, %s1666_s27  }
  0x2c   : > { %1364 = vmatprep.mubr.msk.f32.mxu0 %vm383_vm0, %v354_v10  ;;  %v1677_v10 = vmov 0.0|0.0   ;;  %s324_s17 = scalar_lea.vmem [#allocation3], %s323_s14  ;;  %s1090_s22 = scalar_lea.sflag [#allocation4], %s323_s14 }
  0x2d   : > { %1491 = vmatprep.subr.bf16.mxu0 %v1677_v10  ;;  %s1105_s18 = sshll.u32 %s324_s17, 4  ;;  %s1934_s18 = int_to_ptr.vmem [resolvable:$true] %s1105_s18 }
  0x2e   : > { %s1612_s23 = scalar_lea.vmem %s1934_s18, 16  ;;  %p1619_p0 = scmp.lt.s32.totalorder %s1934_s18, %s1617_s24 }
  0x2f   : > { %1365 = vmatmul.mubr.msk.f32.gmra.mrb[4].mxu0 %vm383_vm0, %v355_v11  ;;  %v378_v11 = vld [vmem:[%s1978_s4] sm:$0xff]  ;;  %p1613_p11 = scmp.ne.s32.totalorder %s1934_s18, %s1612_s23  ;;  %p1620_p1 = scmp.lt.s32.totalorder %s1618_s25, %s1612_s23 }
  0x30   : > { %1367 = vmatprep.mubr.msk.f32.mxu0 %vm383_vm0, %v356_v12  ;;  %v379_v12 = vld [vmem:[%s1978_s4 + $0x8] sm:$0xff] }
  0x31   : > { %p1614_p12 = pnand %p1613_p11, %p1764_p5  ;;  %p1621_p2 = por %p1620_p1, %p1619_p0 }
  0x33   : > { %1368 = vmatmul.mubr.msk.f32.gmra.mrb[6].mxu0 %vm383_vm0, %v357_v13  ;;  %v1484_v13 = vpack.c.bf16 %v379_v12, %v378_v11  ;;  %p1615_p13 = pneg %p1614_p12 }
  0x34   : > { %1370 = vmatprep.mubr.msk.f32.mxu0 %vm383_vm0, %v358_v14 }
  0x35   : > { %p1622_p3 = pnand %p1621_p2, %p1615_p13 }
  0x37   : > { %1371 = vmatmul.mubr.msk.f32.gmra.mrb[8].mxu0 %vm383_vm0, %v359_v15  ;;  %v380_v15 = vld [vmem:[%s1978_s4 + $0x10] sm:$0xff] }
  0x38   : > { %1373 = vmatprep.mubr.msk.f32.mxu0 %vm383_vm0, %v360_v16  ;;  %v381_v16 = vld [vmem:[%s1978_s4 + $0x18] sm:$0xff] }
  0x3b   : > { %1374 = vmatmul.mubr.msk.f32.gmra.mrb[10].mxu0 %vm383_vm0, %v361_v17  ;;  %v1488_v17 = vpack.c.bf16 %v381_v16, %v380_v15 }
  0x3c   : > { %1376 = vmatprep.mubr.msk.f32.mxu0 %vm383_vm0, %v362_v18  ;;  %v1679_v18 = vmov 0.0  }
  0x3f   : > { %1377 = vmatmul.mubr.msk.f32.gmra.mrb[12].mxu0 %vm383_vm0, %v363_v19 }
  0x40   : > { %1379 = vmatprep.mubr.msk.f32.mxu0 %vm383_vm0, %v364_v20 }
  0x43   : > { %1380 = vmatmul.mubr.msk.f32.gmra.mrb[14].mxu0 %vm383_vm0, %v365_v21 }
  0x44   : > { %1437 = vmatprep.mubr.msk.f32.mxu0 %vm1678_vm3, %v1679_v18 }
  0xfa   : > { %v1360_v22 = vpop.f32.mrb[0].mxu0 }
  0xfb   : > { %v498_v23 = vpop.f32.mrb[1].mxu0 }
  0xfe   : > { %v1363_v24 = vpop.f32.mrb[2].mxu0 }
  0xff   : > { %v508_v25 = vpop.f32.mrb[3].mxu0 }
 0x102   : > { %v1366_v26 = vpop.f32.mrb[4].mxu0 }
 0x103   : > { %v518_v27 = vpop.f32.mrb[5].mxu0 }
 0x106   : > { %v1369_v28 = vpop.f32.mrb[6].mxu0 }
 0x107   : > { %v528_v29 = vpop.f32.mrb[7].mxu0 }
 0x10a   : > { %v1372_v30 = vpop.f32.mrb[8].mxu0 }
 0x10b   : > { %v538_v31 = vpop.f32.mrb[9].mxu0 }
 0x10c   : > { %v1568_v32 = vpack.i.bf16 %v1372_v30, %v538_v31 }
 0x10e   : > { %1569 = vrot.lane.b32.xlu0 %v1568_v32, %s1676_s30  ;;  %v1375_v33 = vpop.f32.mrb[10].mxu0 }
 0x10f   : > { %v548_v34 = vpop.f32.mrb[11].mxu0 }
 0x110   : > { %v1573_v35 = vpack.i.bf16 %v1375_v33, %v548_v34 }
 0x112   : > { %1574 = vrot.lane.b32.xlu0 %v1573_v35, %s1676_s30  ;;  %v1378_v36 = vpop.f32.mrb[12].mxu0 }
 0x113   : > { %v558_v37 = vpop.f32.mrb[13].mxu0 }
 0x114   : > { %v1578_v39 = vpack.i.bf16 %v1378_v36, %v558_v37 }
 0x116   : > { %1579 = vrot.lane.b32.xlu1 %v1578_v39, %s1676_s30  ;;  %v1381_v40 = vpop.f32.mrb[14].mxu0 }
 0x117   : > { %v568_v41 = vpop.f32.mrb[15].mxu0 }
 0x118   : > { %v1583_v42 = vpack.i.bf16 %v1381_v40, %v568_v41 }
 0x11a   : > { %1584 = vrot.lane.b32.xlu1 %v1583_v42, %s1676_s30  ;;  %s1869_s30 = scalar_lea.vmem %s1980_s6, %s1776_s15  ;;  %s1680_s15 = smov 96  }
 0x180   : > { %v1570_v43 = vpop.permute.xlu0 %1569 }
 0x181   : > { %v1572_v44 = vunpack.i.h.bf16 %v1570_v43  ;;  %v1571_v45 = vunpack.i.l.bf16 %v1570_v43 }
 0x183   : > { %v609_v46 = vsel %vm383_vm0, %v498_v23, %v1571_v45  ;;  %v610_v47 = vsel %vm383_vm0, %v1360_v22, %v1572_v44 }
 0x184   : > { %v1575_v48 = vpop.permute.xlu0 %1574  ;;  %v1467_v49 = vpack.c.bf16 %v610_v47, %v609_v46 }
 0x185   : > { %v1577_v50 = vunpack.i.h.bf16 %v1575_v48  ;;  %v1576_v51 = vunpack.i.l.bf16 %v1575_v48 }
 0x186   : > { %1468 = vmatprep.subr.bf16.mxu1 %v1467_v49 }
 0x187   : > { %1470 = vmatpush3.bf16.msra.mxu1 %v1467_v49  ;;  %v611_v52 = vsel %vm383_vm0, %v508_v25, %v1576_v51  ;;  %v612_v53 = vsel %vm383_vm0, %v1363_v24, %v1577_v50 }
 0x188   : > { %v1580_v54 = vpop.permute.xlu1 %1579  ;;  %v1471_v55 = vpack.c.bf16 %v612_v53, %v611_v52 }
 0x189   : > { %v1582_v56 = vunpack.i.h.bf16 %v1580_v54  ;;  %v1581_v57 = vunpack.i.l.bf16 %v1580_v54 }
 0x18a   : > { %1472 = vmatprep.subr.bf16.mxu1 %v1471_v55 }
 0x18b   : > { %1474 = vmatpush3.bf16.msra.mxu1 %v1471_v55  ;;  %v613_v58 = vsel %vm383_vm0, %v518_v27, %v1581_v57  ;;  %v614_v59 = vsel %vm383_vm0, %v1366_v26, %v1582_v56 }
 0x18c   : > { %v1585_v60 = vpop.permute.xlu1 %1584  ;;  %v1475_v61 = vpack.c.bf16 %v614_v59, %v613_v58 }
 0x18d   : > { %v1587_v62 = vunpack.i.h.bf16 %v1585_v60  ;;  %v1586_v63 = vunpack.i.l.bf16 %v1585_v60 }
 0x18e   : > { %1476 = vmatprep.subr.bf16.mxu1 %v1475_v61 }
 0x18f   : > { %1478 = vmatpush3.bf16.msra.mxu1 %v1475_v61  ;;  %v615_v0 = vsel %vm383_vm0, %v528_v29, %v1586_v63  ;;  %v616_v1 = vsel %vm383_vm0, %v1369_v28, %v1587_v62 }
 0x190   : > { %v1479_v2 = vpack.c.bf16 %v616_v1, %v615_v0 }
 0x192   : > { %1480 = vmatprep.subr.bf16.mxu1 %v1479_v2 }
 0x193   : > { %1482 = vmatpush3.bf16.msra.mxu1 %v1479_v2 }
 0x194   : > { %1483 = vmatprep.subr.bf16.mxu1 %v1677_v10 }
 0x196   : > { %1399 = vmatmul.mubr.msk.f32.vlgmr.msra.gmra.mrb[0].mxu1 %vm617_vm1, %v367_v3 }
 0x197   : > { %1401 = vmatprep.mubr.msk.f32.mxu1 %vm617_vm1, %v368_v4 }
 0x19a   : > { %1402 = vmatmul.mubr.msk.f32.gmra.mrb[2].mxu1 %vm617_vm1, %v369_v5 }
 0x19b   : > { %1404 = vmatprep.mubr.msk.f32.mxu1 %vm617_vm1, %v370_v6 }
 0x19c   : > { %1486 = vmatpush3.bf16.xpose.msk.msra.mxu1 %vm1845_vm2, %v1484_v13 }
 0x19d   : > { %1487 = vmatprep.subr.bf16.mxu1 %v1677_v10 }
 0x19e   : > { %1405 = vmatmul.mubr.msk.f32.gmra.mrb[4].mxu1 %vm617_vm1, %v371_v7 }
 0x19f   : > { %1407 = vmatprep.mubr.msk.f32.mxu1 %vm617_vm1, %v372_v8 }
 0x1a2   : > { %1408 = vmatmul.mubr.msk.f32.gmra.mrb[6].mxu1 %vm617_vm1, %v373_v9 }
 0x1a3   : > { %1418 = vmatprep.mubr.msk.f32.mxu1 %vm1678_vm3, %v1679_v18 }
 0x1a4   : > { %1490 = vmatpush3.bf16.xpose.msk.msra.mxu1 %vm1845_vm2, %v1488_v17 }
 0x1a5   : > { %1507 = vmatprep.subr.bf16.mxu1 %v1677_v10 }
 0x269   : > { %v1400_v19 = vpop.f32.mrb[0].mxu1 }
 0x26a   : > { %v748_v20 = vmax.f32 %v1400_v19, 0.0  ;;  %v708_v21 = vpop.f32.mrb[1].mxu1 }
 0x26b   : > { %v747_v22 = vmax.f32 %v708_v21, 0.0 }
 0x26c   : > { %756 = vst.msk [vmem:[%s1869_s30 + $0x8] sm:$0xff] %vm617_vm1, %v748_v20  ;;  %v764_v23 = vsel %vm383_vm0, %v748_v20, 0.0 }
 0x26d   : > { %755 = vst.msk [vmem:[%s1869_s30] sm:$0xff] %vm617_vm1, %v747_v22  ;;  %v763_v24 = vsel %vm383_vm0, %v747_v22, 0.0  ;;  %v1492_v25 = vpack.c.bf16 %v748_v20, %v747_v22  ;;  %v1403_v26 = vpop.f32.mrb[2].mxu1  ;;  %v1588_v27 = vpack.i.bf16 %v748_v20, %v747_v22 }
 0x26e   : > { %v765_v28 = vadd.f32 %v764_v23, %v763_v24  ;;  %v750_v29 = vmax.f32 %v1403_v26, 0.0  ;;  %v718_v30 = vpop.f32.mrb[3].mxu1 }
 0x26f   : > { %v749_v31 = vmax.f32 %v718_v30, 0.0  ;;  %1589 = vrot.lane.b32.xlu0 %v1588_v27, %s1680_s15  ;;  %1494 = vmatpush3.bf16.xpose.msk.msra.mxu0 %vm1845_vm2, %v1492_v25 }
 0x270   : > { %758 = vst.msk [vmem:[%s1869_s30 + $0x18] sm:$0xff] %vm617_vm1, %v750_v29  ;;  %1495 = vmatprep.subr.bf16.mxu0 %v1677_v10  ;;  %v768_v39 = vsel %vm383_vm0, %v750_v29, 0.0 }
 0x271   : > { %757 = vst.msk [vmem:[%s1869_s30 + $0x10] sm:$0xff] %vm617_vm1, %v749_v31  ;;  %v766_v32 = vsel %vm383_vm0, %v749_v31, 0.0  ;;  %v1496_v33 = vpack.c.bf16 %v750_v29, %v749_v31  ;;  %v1406_v34 = vpop.f32.mrb[4].mxu1  ;;  %v1593_v35 = vpack.i.bf16 %v750_v29, %v749_v31 }
 0x272   : > { %v767_v36 = vadd.f32 %v766_v32, %v765_v28  ;;  %v752_v37 = vmax.f32 %v1406_v34, 0.0  ;;  %v728_v38 = vpop.f32.mrb[5].mxu1  ;;  %v1081_v28 = vstv %s382_s10 }
 0x273   : > { %v751_v40 = vmax.f32 %v728_v38, 0.0  ;;  %1594 = vrot.lane.b32.xlu1 %v1593_v35, %s1680_s15 }
 0x274   : > { %760 = vst.msk [vmem:[%s1869_s30 + $0x28] sm:$0xff] %vm617_vm1, %v752_v37  ;;  %v769_v41 = vadd.f32 %v768_v39, %v767_v36  ;;  %v772_v49 = vsel %vm383_vm0, %v752_v37, 0.0 }
 0x275   : > { %759 = vst.msk [vmem:[%s1869_s30 + $0x20] sm:$0xff] %vm617_vm1, %v751_v40  ;;  %v770_v42 = vsel %vm383_vm0, %v751_v40, 0.0  ;;  %v1500_v43 = vpack.c.bf16 %v752_v37, %v751_v40  ;;  %v1409_v44 = vpop.f32.mrb[6].mxu1  ;;  %v1598_v45 = vpack.i.bf16 %v752_v37, %v751_v40 }
 0x276   : > { %v771_v46 = vadd.f32 %v770_v42, %v769_v41  ;;  %v754_v47 = vmax.f32 %v1409_v44, 0.0  ;;  %v738_v48 = vpop.f32.mrb[7].mxu1 }
 0x277   : > { %v753_v50 = vmax.f32 %v738_v48, 0.0  ;;  %1498 = vmatpush3.bf16.xpose.msk.msra.mxu0 %vm1845_vm2, %v1496_v33  ;;  %1599 = vrot.lane.b32.xlu0 %v1598_v45, %s1680_s15 }
 0x278   : > { %762 = vst.msk [vmem:[%s1869_s30 + $0x38] sm:$0xff] %vm617_vm1, %v754_v47  ;;  %v773_v51 = vadd.f32 %v772_v49, %v771_v46  ;;  %1499 = vmatprep.subr.bf16.mxu0 %v1677_v10  ;;  %v776_v56 = vsel %vm383_vm0, %v754_v47, 0.0 }
 0x279   : > { %761 = vst.msk [vmem:[%s1869_s30 + $0x30] sm:$0xff] %vm617_vm1, %v753_v50  ;;  %v774_v52 = vsel %vm383_vm0, %v753_v50, 0.0  ;;  %v1504_v53 = vpack.c.bf16 %v754_v47, %v753_v50  ;;  %v1603_v54 = vpack.i.bf16 %v754_v47, %v753_v50 }
 0x27a   : > { %v775_v55 = vadd.f32 %v774_v52, %v773_v51 }
 0x27b   : > { %1604 = vrot.lane.b32.xlu1 %v1603_v54, %s1680_s15 }
 0x27c   : > { %v777_v57 = vadd.f32 %v776_v56, %v775_v55 }
 0x27e   : > { %v778_v58 = vrot.slane %v777_v57, 4 }
 0x27f   : > { %1502 = vmatpush3.bf16.xpose.msk.msra.mxu0 %vm1845_vm2, %v1500_v43 }
 0x280   : > { %v779_v59 = vadd.f32 %v778_v58, %v777_v57  ;;  %1503 = vmatprep.subr.bf16.mxu0 %v1677_v10 }
 0x282   : > { %v780_v60 = vrot.slane %v779_v59, 2 }
 0x284   : > { %v781_v61 = vadd.f32 %v780_v60, %v779_v59 }
 0x286   : > { %v782_v62 = vrot.slane %v781_v61, 1 }
 0x287   : > { %1506 = vmatpush3.bf16.xpose.msk.msra.mxu0 %vm1845_vm2, %v1504_v53 }
 0x288   : > { %v783_v63 = vadd.f32 %v782_v62, %v781_v61 }
 0x28a   : > { %v1259_v0 = vmul.f32 -0.015625, %v783_v63 }
 0x28c   : > { %v787_v1 = vmul.f32 1.442695, %v1259_v0 }
 0x28e   : > { %1608 = vpow2.f32 %v787_v1 }
 0x298   : > { %v1609_v2 = vpop.eup %1608 }
 0x299   : > { %v789_v3 = vadd.f32 1.0, %v1609_v2 }
 0x29b   : > { %1610 = vrcp.f32 %v789_v3 }
 0x2a5   : > { %v1611_v4 = vpop.eup %1610 }
 0x2a6   : > { %1419 = vmatmul.mubr.msk.f32.vlgmr.msra.gmra.mrb[8].mxu1 %vm383_vm0, %v1611_v4 }
 0x2a7   : > { %1456 = vmatprep.mubr.msk.f32.mxu1 %vm1678_vm3, %v1679_v18 }
 0x2e1   : > { %v1590_v5 = vpop.permute.xlu0 %1589 }
 0x2e2   : > { %v1592_v6 = vunpack.i.h.bf16 %v1590_v5  ;;  %v1591_v7 = vunpack.i.l.bf16 %v1590_v5 }
 0x2e4   : > { %v1508_v8 = vpack.c.bf16 %v1592_v6, %v1591_v7 }
 0x2e5   : > { %v1595_v9 = vpop.permute.xlu1 %1594 }
 0x2e6   : > { %1510 = vmatpush3.bf16.xpose.msk.msra.mxu1 %vm1845_vm2, %v1508_v8  ;;  %v1597_v11 = vunpack.i.h.bf16 %v1595_v9  ;;  %v1596_v12 = vunpack.i.l.bf16 %v1595_v9 }
 0x2e7   : > { %1511 = vmatprep.subr.bf16.mxu1 %v1677_v10 }
 0x2e8   : > { %v1512_v13 = vpack.c.bf16 %v1597_v11, %v1596_v12 }
 0x2e9   : > { %v1600_v15 = vpop.permute.xlu0 %1599 }
 0x2ea   : > { %v1602_v16 = vunpack.i.h.bf16 %v1600_v15  ;;  %v1601_v17 = vunpack.i.l.bf16 %v1600_v15 }
 0x2ec   : > { %v1516_v18 = vpack.c.bf16 %v1602_v16, %v1601_v17 }
 0x2ed   : > { %v1605_v19 = vpop.permute.xlu1 %1604 }
 0x2ee   : > { %1514 = vmatpush3.bf16.xpose.msk.msra.mxu1 %vm1845_vm2, %v1512_v13  ;;  %v1607_v20 = vunpack.i.h.bf16 %v1605_v19  ;;  %v1606_v21 = vunpack.i.l.bf16 %v1605_v19 }
 0x2ef   : > { %1515 = vmatprep.subr.bf16.mxu1 %v1677_v10 }
 0x2f0   : > { %v1520_v22 = vpack.c.bf16 %v1607_v20, %v1606_v21 }
 0x2f6   : > { %1518 = vmatpush3.bf16.xpose.msk.msra.mxu1 %vm1845_vm2, %v1516_v18 }
 0x2f7   : > { %1519 = vmatprep.subr.bf16.mxu1 %v1677_v10 }
 0x2fe   : > { %1522 = vmatpush3.bf16.xpose.msk.msra.mxu1 %vm1845_vm2, %v1520_v22 }
 0x379   : > { %v873_v23 = vpop.f32.mrb[8].mxu1 }
 0x37a   : > { %v1420_v24 = vpop.f32.mrb[9].mxu1  ;;  %1438 = vmatmul.mubr.msk.f32.vlgmr.msra.gmra.mrb[16].mxu0 %vm383_vm0, %v873_v23  ;;  %1457 = vmatmul.mubr.msk.f32.vlgmr.msra.gmra.mrb[10].mxu1 %vm383_vm0, %v873_v23 }
 0x44d   : > { %v970_v25 = vpop.f32.mrb[16].mxu0  ;;  %v1072_v26 = vpop.f32.mrb[10].mxu1 }
 0x44e   : > { %v1439_v27 = vpop.f32.mrb[17].mxu0  ;;  %1077 = vrot.lane.b32.xlu0 %v1072_v26, %s1681_s9  ;;  %v1458_v10 = vpop.f32.mrb[11].mxu1 }
 0x4c0   : > { %v1078_v14 = vpop.permute.xlu0 %1077 }
 0x4c1   : > { %v1080_v29 = vsel %vm617_vm1, %v970_v25, %v1078_v14 }
 0x4c2   : > { %v1082_v30 = vadd.f32 %v1081_v28, %v1080_v29 }
 0x4c4   : > { %1083 = vst [vmem:[%s324_s17] sm:$0x1] %v1082_v30 }
 0x4c5   : > { %1625 = shalt.err (!%p1622_p3)
}
 0x4c6   : > { %s1626_s30 = scalar_lea.hbm %s1932_s21, 16  ;;  %s1630_s10 = scalar_lea.hbm %s1981_s7, 32 }
 0x4c7   : > { %p1627_p4 = scmp.ne.s32.totalorder %s1932_s21, %s1626_s30  ;;  %p1631_p9 = scmp.lt.u32.totalorder %s1932_s21, %s1981_s7 }
 0x4c8   : > { %p1632_p10 = scmp.lt.u32.totalorder %s1630_s10, %s1626_s30  ;;  %p1634_p12 = scmp.lt.u32.totalorder %s1626_s30, %s1932_s21 }
 0x4c9   : > { %p1628_p7 = pnand %p1627_p4, %p1764_p5 }
 0x4ca   : > { %p1633_p11 = por %p1632_p10, %p1631_p9 }
 0x4cb   : > { %p1629_p8 = pneg %p1628_p7 }
 0x4cc   : > { %p1635_p13 = por %p1634_p12, %p1633_p11 }
 0x4ce   : > { %p1636_p0 = pnand %p1635_p13, %p1629_p8 }
 0x4d0   : > { %1639 = shalt.err (!%p1636_p0)
}
 0x4d1   : > { %1523 = dma.vmem_to_hbm [thread:$0]  (%p1764_p5), %s1934_s18, 16, %s1932_s21, %s1090_s22  }
 0x4d2 PF: > { %p1529_p1 = scmp.ge.s32.totalorder %s1674_s29, 2  ;;  %s1125_s17 = sand.u32 1, %s1662_s26  }
 0x4d3   : > { %s1126_s19 = scalar_lea.sflag [#allocation4], %s1125_s17 }
 0x4d4   : > { %p1526_p2 = pnand %p1529_p1, %p1768_p6 }
 0x4d6   : > { %1657 = dma.done.wait (!%p1526_p2), %s1126_s19, 16  }
 0x4d7   : > { %1659 = vsyncadd (!%p1526_p2), %s1126_s19, 4294967280  ;;  %p19_p3 = scmp.ge.s32.totalorder %s1751_s8, 4   ;;  %s1986_s26 = smov %s1666_s27 }
 0x4d8   : > { %s1987_s27 = smov %s1670_s28  ;;  %s1988_s28 = smov %s1762_s11 }
 0x4d9   : > { %s1989_s29 = smov %s1751_s8  ;;  %21 = sbr.rel (!%p19_p3) target bundleno = 5 (0x5), region = 100 }
 0x4e0   :  { %1130 = vsyncpa [#allocation4], 1 }
 0x4e1   :  { %1132 = vsyncpa [#allocation4 + $0x1], 1 }

</bundles_post_ra>
